<compile_context>
chip_gen: v7x
topology: tpu7x:2x2x1
jax: 0.10.0
libtpu: 0.0.40
codegen_flags: <defaults>
</compile_context>

<pallas_src>
import functools
import math

import jax
import jax.numpy as jnp
from jax.experimental import pallas as pl
from jax.experimental.pallas import tpu as pltpu


def _round_up(x, m):
    return ((x + m - 1) // m) * m


def _choose_packing(h_dim, min_width=512, max_width=2048):
    """Pick (group, width): pack `group` consecutive time scalars per output row so
    width = group * h_dim is a multiple of 128 lanes (unmasked stores), widened to
    >= min_width lanes so the x-block lane-padding waste stays small."""
    g = math.gcd(h_dim, 128)
    base = h_dim * (128 // g)          # lcm(h_dim, 128)
    if base > max_width:
        # TODO(synk): h_dim with a large odd factor -> unpacked fallback (masked stores).
        return 1, h_dim
    width = base
    while width < min_width and width * 2 <= max_width:
        width *= 2
    return width // h_dim, width


def _time2vec_kernel(x_ref, e_ref, b_ref, mask_ref, o_ref, *, use_sin, chunk):
    """One grid step.

    x_ref    : (TR, GROUP)  packed time scalars (GROUP consecutive flat elements/row)
    e_ref    : (GROUP, W)   expansion matrix with weights folded in:
                            E[g, c] = w_full[c % H] if c // H == g else 0
    b_ref    : (1, W)       [b0 | b] tiled GROUP times
    mask_ref : (1, W)       1.0 on the linear (feature-0) lane of each group, else 0.0
    o_ref    : (TR, W)      lane-dense output; row-major identical to (TR*GROUP, H)
    """
    rows = o_ref.shape[0]
    e = e_ref[...]                                   # (GROUP, W)
    b = b_ref[...]                                   # (1, W)
    lin = mask_ref[...] != 0.0                       # (1, W), hoisted out of the loop
    f = jnp.sin if use_sin else jnp.cos
    n_chunks = rows // chunk                         # static; TR is a multiple of chunk

    # Inner chunking bounds the live intermediates (dot result, f(v)) to ~chunk*W
    # floats while keeping the large DMA tile for per-grid-step amortization.
    def body(c, carry):
        r0 = pl.multiple_of(c * chunk, chunk)
        xg = x_ref[pl.ds(r0, chunk), :]              # (chunk, GROUP)
        # MXU does the lane expansion and the weight multiply in one shot (K = GROUP).
        v = jnp.dot(xg, e, preferred_element_type=jnp.float32) + b
        o_ref[pl.ds(r0, chunk), :] = jnp.where(lin, v, f(v)).astype(o_ref.dtype)
        return carry

    jax.lax.fori_loop(0, n_chunks, body, 0)


def time2vec(x, w0, b0, w, b, *, activ="sin", out_dtype=jnp.float32,
             max_tile_rows=32768, chunk_rows=512):
    """Pallas Time2Vec forward, matching the PyTorch module:
        v0 = x*w0 + b0 ; v1 = f(x*w + b) ; concat([v0, v1], -1)
    x: any shape of time scalars; returns x.shape + (h_dim,) in `out_dtype`.
    """
    orig_shape = x.shape
    h_dim = w.shape[1] + 1
    group, width = _choose_packing(h_dim)

    # Fused parameters; lane 0 of each h_dim-wide slot is the linear term.
    w_full = jnp.concatenate([w0, w], axis=-1).astype(jnp.float32).reshape(-1)   # (H,)
    b_full = jnp.concatenate([b0, b], axis=-1).astype(jnp.float32).reshape(-1)   # (H,)
    b_tiled = jnp.tile(b_full, group).reshape(1, width)
    lin_mask = jnp.tile(
        jnp.zeros((h_dim,), jnp.float32).at[0].set(1.0), group).reshape(1, width)
    # Expansion matrix with the weights folded in.
    expand = (jnp.eye(group, dtype=jnp.float32)[:, :, None]
              * w_full[None, None, :]).reshape(group, width)

    x_flat = x.reshape(-1).astype(jnp.float32)
    n = x_flat.shape[0]
    m = pl.cdiv(n, group)                       # packed rows
    pad = m * group - n                         # < group; only when n % group != 0
    if pad:
        x_flat = jnp.pad(x_flat, (0, pad))
    x_packed = x_flat.reshape(m, group)

    # --- Tile budgeting derived from the actual chip's VMEM capacity ----------------
    try:
        vmem_cap = int(pltpu.get_tpu_info().vmem_capacity_bytes)
    except Exception:                           # be conservative if the query fails
        vmem_cap = 64 * 1024 * 1024             # v7x-sized
    vmem_limit = min(vmem_cap * 3 // 4, 96 * 1024 * 1024)
    out_isize = jnp.dtype(out_dtype).itemsize
    bytes_per_row = 4 * _round_up(group, 128) + out_isize * _round_up(width, 128)
    budget = (vmem_limit * 7) // 10             # headroom for chunk temps + Mosaic scratch
    tile_rows = min(max_tile_rows, max(8, budget // (2 * bytes_per_row)))
    # Guarantee >= 2 grid steps when there is enough work (v7x: shard across both TCs).
    tile_rows = min(tile_rows, max(8, _round_up(pl.cdiv(m, 2), 8)))
    tile_rows = max(8, (tile_rows // 8) * 8)
    chunk = min(chunk_rows, tile_rows)
    tile_rows = (tile_rows // chunk) * chunk    # keep TR a multiple of the inner chunk

    kernel = functools.partial(_time2vec_kernel, use_sin=(activ == "sin"), chunk=chunk)

    out = pl.pallas_call(
        kernel,
        out_shape=jax.ShapeDtypeStruct((m, width), out_dtype),
        grid_spec=pltpu.PrefetchScalarGridSpec(
            num_scalar_prefetch=0,
            grid=(pl.cdiv(m, tile_rows),),      # ragged last block handled by Pallas
            in_specs=[
                pl.BlockSpec((tile_rows, group), lambda i: (i, 0)),
                pl.BlockSpec((group, width), lambda i: (0, 0)),
                pl.BlockSpec((1, width), lambda i: (0, 0)),
                pl.BlockSpec((1, width), lambda i: (0, 0)),
            ],
            out_specs=pl.BlockSpec((tile_rows, width), lambda i: (i, 0)),
        ),
        compiler_params=pltpu.CompilerParams(
            dimension_semantics=("parallel",),
            vmem_limit_bytes=vmem_limit,
        ),
    )(x_packed, expand, b_tiled, lin_mask)

    # (m, W) is row-major identical to (m*GROUP, H) = (n + pad, H).
    if pad == 0:
        return out.reshape(*orig_shape, h_dim)
    return out.reshape(-1)[: n * h_dim].reshape(*orig_shape, h_dim)


def time2vec_ref(x, w0, b0, w, b, activ="sin"):
    # Pure-JAX reference mirroring the PyTorch forward.
    f = jnp.sin if activ == "sin" else jnp.cos
    xs = x[..., None].astype(jnp.float32)                 # (..., 1)
    v0 = jnp.matmul(xs, w0) + b0                          # (..., 1)
    v1 = f(jnp.matmul(xs, w) + b)                         # (..., h-1)
    return jnp.concatenate([v0, v1], axis=-1)


if __name__ == "__main__":
    key = jax.random.PRNGKey(0)
    k_x, k_w0, k_b0, k_w, k_b = jax.random.split(key, 5)

    batch, seq, h_dim = 2, 8, 32

    # Parameter shapes match the module: w0,b0 ~ U[0,1); w,b ~ N(0,1).
    w0 = jax.random.uniform(k_w0, (1, 1), dtype=jnp.float32)
    b0 = jax.random.uniform(k_b0, (1, 1), dtype=jnp.float32)
    w = jax.random.normal(k_w, (1, h_dim - 1), dtype=jnp.float32)
    b = jax.random.normal(k_b, (1, h_dim - 1), dtype=jnp.float32)

    x = jax.random.normal(k_x, (batch, seq), dtype=jnp.float32)

    out = time2vec(x, w0, b0, w, b, activ="sin")
    out = jax.block_until_ready(out)

    ref = time2vec_ref(x, w0, b0, w, b, activ="sin")
    assert out.shape == (batch, seq, h_dim), out.shape
    # Tolerance covers the possibility that the f32 MXU matmul is computed with
    # reduced-precision bf16 passes (XLA-default-style); packing/layout bugs would
    # show up as O(1) mismatches and are still caught.
    assert jnp.allclose(out, ref, atol=5e-2, rtol=5e-2), "mismatch vs reference"

    print("KERNEL_OK")
</pallas_src>

<mosaic_0001>
module attributes {stable_mosaic.version = 11 : i64} {
  func.func @_time2vec_kernel(%arg0: i32, %arg1: memref<8x16xf32, #tpu.memory_space<vmem>>, %arg2: memref<16x512xf32, #tpu.memory_space<vmem>>, %arg3: memref<1x512xf32, #tpu.memory_space<vmem>>, %arg4: memref<1x512xf32, #tpu.memory_space<vmem>>, %arg5: memref<8x512xf32, #tpu.memory_space<vmem>>) attributes {dimension_semantics = [#tpu.dimension_semantics<parallel>], iteration_bounds = array<i64: 1>, scalar_prefetch = 0 : i64, scratch_operands = 0 : i64, tpu.core_type = #tpu.core_type<tc>, window_params = [{transform_indices = @transform_0, window_bounds = array<i64: 8, 16>}, {pipeline_mode = #tpu.pipeline_mode<synchronous>, transform_indices = @transform_1, window_bounds = array<i64: 16, 512>}, {pipeline_mode = #tpu.pipeline_mode<synchronous>, transform_indices = @transform_2, window_bounds = array<i64: 1, 512>}, {pipeline_mode = #tpu.pipeline_mode<synchronous>, transform_indices = @transform_3, window_bounds = array<i64: 1, 512>}, {transform_indices = @transform_4, window_bounds = array<i64: 8, 512>}]} {
    %c0 = arith.constant 0 : index
    %c0_0 = arith.constant 0 : index
    %0 = vector.load %arg2[%c0, %c0_0] : memref<16x512xf32, #tpu.memory_space<vmem>>, vector<16x512xf32>
    %c0_1 = arith.constant 0 : index
    %c0_2 = arith.constant 0 : index
    %1 = vector.load %arg3[%c0_1, %c0_2] : memref<1x512xf32, #tpu.memory_space<vmem>>, vector<1x512xf32>
    %c0_3 = arith.constant 0 : index
    %c0_4 = arith.constant 0 : index
    %2 = vector.load %arg4[%c0_3, %c0_4] : memref<1x512xf32, #tpu.memory_space<vmem>>, vector<1x512xf32>
    %cst = arith.constant 0.000000e+00 : f32
    %3 = vector.broadcast %cst : f32 to vector<1x512xf32>
    %4 = arith.cmpf one, %2, %3 : vector<1x512xf32>
    %c0_i32 = arith.constant 0 : i32
    %c8_i32 = arith.constant 8 : i32
    %5 = arith.muli %c0_i32, %c8_i32 : i32
    %6 = tpu.assume_multiple %5, 8 : i32
    %7 = arith.index_cast %6 : i32 to index
    %c0_5 = arith.constant 0 : index
    %8 = vector.load %arg1[%7, %c0_5] : memref<8x16xf32, #tpu.memory_space<vmem>>, vector<8x16xf32>
    %cst_6 = arith.constant dense<0.000000e+00> : vector<8x512xf32>
    %9 = tpu.matmul %8, %0, %cst_6 {dimension_numbers = #tpu.dot_dimension_numbers<[1], [0], [0], [1], [0, 0, 1, 1], [], []>} : vector<8x16xf32>, vector<16x512xf32>, vector<8x512xf32> -> vector<8x512xf32>
    %10 = vector.broadcast %1 : vector<1x512xf32> to vector<8x512xf32>
    %11 = arith.addf %9, %10 : vector<8x512xf32>
    %12 = math.sin %11 : vector<8x512xf32>
    %13 = vector.shape_cast %4 : vector<1x512xi1> to vector<1x512xi1>
    %14 = vector.broadcast %13 : vector<1x512xi1> to vector<8x512xi1>
    %15 = arith.select %14, %11, %12 : vector<8x512xi1>, vector<8x512xf32>
    %16 = arith.index_cast %6 : i32 to index
    %c0_7 = arith.constant 0 : index
    %17 = vector.load %arg5[%16, %c0_7] : memref<8x512xf32, #tpu.memory_space<vmem>>, vector<8x512xf32>
    tpu.vector_store %arg5[%16, %c0_7], %15 {strides = array<i32>} : memref<8x512xf32, #tpu.memory_space<vmem>>, vector<8x512xf32>,
    %c1_i32 = arith.constant 1 : i32
    return
  }
  func.func @transform_0(%arg0: i32) -> (i32, i32) {
    %c0_i32 = arith.constant 0 : i32
    %c0_i32_0 = arith.constant 0 : i32
    return %arg0, %c0_i32 : i32, i32
  }
  func.func @transform_1(%arg0: i32) -> (i32, i32) {
    %c0_i32 = arith.constant 0 : i32
    %c0_i32_0 = arith.constant 0 : i32
    %c0_i32_1 = arith.constant 0 : i32
    return %c0_i32, %c0_i32_0 : i32, i32
  }
  func.func @transform_2(%arg0: i32) -> (i32, i32) {
    %c0_i32 = arith.constant 0 : i32
    %c0_i32_0 = arith.constant 0 : i32
    %c0_i32_1 = arith.constant 0 : i32
    return %c0_i32, %c0_i32_0 : i32, i32
  }
  func.func @transform_3(%arg0: i32) -> (i32, i32) {
    %c0_i32 = arith.constant 0 : i32
    %c0_i32_0 = arith.constant 0 : i32
    %c0_i32_1 = arith.constant 0 : i32
    return %c0_i32, %c0_i32_0 : i32, i32
  }
  func.func @transform_4(%arg0: i32) -> (i32, i32) {
    %c0_i32 = arith.constant 0 : i32
    %c0_i32_0 = arith.constant 0 : i32
    return %arg0, %c0_i32 : i32, i32
  }
}

</mosaic_0001>

<bundles_post_ra>
// kernel: tpu_custom_call.1
= control target key start
LH: loop header
LB: loop body
LE: loop exit
PB: predicated region body
PF: predicated region fallthrough
CT: control target
= control target key end

     0   :  { %9 = vsyncpa [#allocation3], 0  ;;  %s1337_s0 = inlined_call_operand.hbm [shape: f32[1,16], index: 0, kind: input, shape index: {}]   ;;  %s1338_s1 = inlined_call_operand.hbm [shape: f32[16,512], index: 1, kind: input, shape index: {}]   ;;  %s1339_s2 = inlined_call_operand.vmem [shape: f32[1,512], index: 2, kind: input, shape index: {}]   ;;  %s1340_s3 = inlined_call_operand.vmem [shape: f32[1,512], index: 3, kind: input, shape index: {}]   ;;  %s1341_s4 = inlined_call_operand.hbm [shape: f32[1,512], index: 4, kind: output, shape index: {}]  }
   0x1   :  { %10 = vsyncpa [#allocation6], 0 }
   0x2   :  { %11 = vsyncpa [#allocation4], 0 }
   0x3   :  { %16 = vsyncadd [#allocation3], 112  ;;  %s926_s15 = smov [#allocation2]   ;;  %s854_s19 = scalar_lea.hbm %s1337_s0, 16 }
   0x4   :  { %s17_s16 = sshll.u32 %s926_s15, 4  ;;  %p855_p0 = scmp.ne.s32.totalorder %s1337_s0, %s854_s19  ;;  %s18_s16 = int_to_ptr.vmem [resolvable:$true] %s17_s16 }
   0x5   :  { %p858_p1 = scmp.lt.u32.totalorder %s854_s19, %s1337_s0 }
   0x7   :  { %p860_p2 = pnand %p858_p1, %p855_p0 }
   0x9   :  { %863 = shalt.err (!%p860_p2)
}
   0xa   :  { %s864_s24 = scalar_lea.vmem %s18_s16, 16  ;;  %s868_s25 = scalar_lea.vmem %s18_s16, 128 }
   0xb   :  { %p865_p3 = scmp.ne.s32.totalorder %s18_s16, %s864_s24  ;;  %p869_p4 = scmp.lt.s32.totalorder %s18_s16, %s18_s16 }
   0xc   :  { %p870_p5 = scmp.lt.s32.totalorder %s868_s25, %s864_s24 }
   0xe   :  { %p871_p6 = por %p870_p5, %p869_p4 }
  0x10   :  { %p872_p7 = pnand %p871_p6, %p865_p3 }
  0x12   :  { %875 = shalt.err (!%p872_p7)
}
  0x13   :  { %s927_s26 = smov 16   ;;  %s928_s27 = smov 1  }
  0x14   :  { %23 = dma.hbm_to_vmem [thread:$0]  %s1337_s0, 16, %s18_s16, [#allocation3], %s927_s26, %s927_s26, %s928_s27  }
  0x15   :  { %s929_s30 = smov [#allocation5]   ;;  %s876_s8 = scalar_lea.hbm %s1338_s1, 1024 }
  0x16   :  { %s29_s5 = sshll.u32 %s929_s30, 4  ;;  %p877_p8 = scmp.ne.s32.totalorder %s1338_s1, %s876_s8  ;;  %s30_s5 = int_to_ptr.vmem [resolvable:$true] %s29_s5 }
  0x17   :  { %p880_p9 = scmp.lt.u32.totalorder %s876_s8, %s1338_s1 }
  0x19   :  { %p882_p10 = pnand %p880_p9, %p877_p8 }
  0x1b   :  { %885 = shalt.err (!%p882_p10)
}
  0x1c   :  { %s886_s13 = scalar_lea.vmem %s30_s5, 1024  ;;  %p891_p12 = scmp.lt.s32.totalorder %s30_s5, %s30_s5 }
  0x1d   :  { %p887_p11 = scmp.ne.s32.totalorder %s30_s5, %s886_s13  ;;  %p892_p13 = scmp.lt.s32.totalorder %s886_s13, %s886_s13 }
  0x1f   :  { %p893_p0 = por %p892_p13, %p891_p12 }
  0x21   :  { %p894_p1 = pnand %p893_p0, %p887_p11 }
  0x23   :  { %897 = shalt.err (!%p894_p1)
}
  0x24   :  { %s930_s0 = smov 512   ;;  %s931_s14 = smov 32  }
  0x25   :  { %35 = dma.hbm_to_vmem [thread:$0]  %s1338_s1, 1024, %s30_s5, [#allocation6], %s930_s0, %s930_s0, %s931_s14  }
  0x26   :  { %920 = dma.done.wait [#allocation3], 128  }
  0x27   :  { %921 = vsyncadd [#allocation3], 4294967168 }
  0x28   :  { %922 = dma.done.wait [#allocation6], 1024  }
  0x29   :  { %923 = vsyncadd [#allocation6], 4294966272  ;;  %v932_v0 = vmov 0.0   ;;  %v47_v1 = vld [vmem:[#allocation5 + $0x8] sm:$0xff]  ;;  %v49_v3 = vld [vmem:[#allocation5 + $0x18] sm:$0xff]  ;;  %vm79_vm0 = vcmask 130048   ;;  %v59_v14 = vlaneseq }
  0x2a   :  { %147 = vmatprep.mubr.f32.mxu0 %v932_v0  ;;  %218 = vmatprep.mubr.f32.mxu1 %v932_v0  ;;  %v51_v2 = vld [vmem:[#allocation5 + $0x28] sm:$0xff]  ;;  %v53_v5 = vld [vmem:[#allocation5 + $0x38] sm:$0xff]  ;;  %v46_v6 = vld [vmem:[#allocation5] sm:$0xff]  ;;  %v933_v57 = vmov 683565275  }
  0x2b   :  { %v796_v4 = vpack.c.bf16 %v51_v2, %v47_v1  ;;  %v50_v7 = vld [vmem:[#allocation5 + $0x20] sm:$0xff]  ;;  %v800_v8 = vpack.c.bf16 %v53_v5, %v49_v3  ;;  %v48_v10 = vld [vmem:[#allocation5 + $0x10] sm:$0xff]  ;;  %v57_v13 = vld [vmem:[#allocation2] sm:$0xff]  ;;  %v994_v15 = vshrl.u32 %v59_v14, 7  ;;  %v934_v61 = vmov 2475754826  }
  0x2c   :  { %v798_v9 = vpack.c.bf16 %v50_v7, %v46_v6  ;;  %v52_v11 = vld [vmem:[#allocation5 + $0x30] sm:$0xff]  ;;  %v54_v17 = vld [vmem:[%s1339_s2] sm:$0xf]  ;;  %v935_v63 = vmov 2131351028  }
  0x2d   :  { %797 = vmatprep.subr.bf16.mxu0 %v796_v4  ;;  %v802_v12 = vpack.c.bf16 %v52_v11, %v48_v10  ;;  %801 = vmatprep.subr.bf16.mxu1 %v800_v8  ;;  %v61_v16 = vsub.s32 0, %v994_v15  ;;  %v69_v18 = vsub.s32 2, %v994_v15  ;;  %v65_v19 = vsub.s32 1, %v994_v15 }
  0x2e   :  { %799 = vmatpush1.bf16.msra.mxu0 %v798_v9  ;;  %v73_v43 = vsub.s32 3, %v994_v15  ;;  %v936_v1 = vmov 2102212464   ;;  %v937_v3 = vmov 920167782  }
  0x2f   :  { %803 = vmatpush1.bf16.msra.mxu1 %v802_v12  ;;  %v62_v20 = vrot.slane %v54_v17, %v61_v16  ;;  %v70_v21 = vrot.slane %v54_v17, %v69_v18  ;;  %v66_v22 = vrot.slane %v54_v17, %v65_v19  ;;  %v938_v10 = vmov 1326507024  }
  0x30   :  { %v1034_v55 = vrot.slane %v54_v17, %v73_v43 }
  0x31   :  { %778 = vmatmul.mubr.msk.f32.vlgmr.msra.gmra.mrb[0].mxu0 %vm79_vm0, %v57_v13 }
  0x32   :  { %779 = vmatmul.mubr.msk.f32.vlgmr.msra.gmra.mrb[0].mxu1 %vm79_vm0, %v57_v13 }
 0x104   :  { %v149_v23 = vpop.f32.mrb[0].mxu0 }
 0x105   :  { %v1008_v24 = vadd.f32 %v149_v23, %v62_v20  ;;  %v220_v25 = vpop.f32.mrb[0].mxu1  ;;  %v151_v26 = vpop.f32.mrb[1].mxu0 }
 0x106   :  { %v1010_v27 = vadd.f32 %v220_v25, %v70_v21  ;;  %v1012_v28 = vadd.f32 %v151_v26, %v66_v22  ;;  %v1014_v29 = vpop.f32.mrb[1].mxu1 }
 0x107   :  { %v225_v30 = vand.u32 2147483647, %v1008_v24  ;;  %v228_v31 = vand.u32 2139095040, %v1008_v24 }
 0x108   :  { %v433_v32 = vand.u32 2147483647, %v1010_v27  ;;  %v436_v33 = vand.u32 2139095040, %v1010_v27  ;;  %v332_v38 = vand.u32 2139095040, %v1012_v28 }
 0x109   :  { %v229_v34 = vshrl.u32 %v228_v31, 23  ;;  %v232_v35 = vand.u32 8388607, %v225_v30 }
 0x10a   :  { %v437_v36 = vshrl.u32 %v436_v33, 23  ;;  %v440_v37 = vand.u32 8388607, %v433_v32  ;;  %v333_v41 = vshrl.u32 %v332_v38, 23 }
 0x10b   :  { %v780_v39 = vadd.s32 4294967169, %v229_v34  ;;  %v233_v44 = vor.u32 8388608, %v232_v35 }
 0x10c   :  { %v788_v40 = vadd.s32 4294967169, %v437_v36  ;;  %v441_v45 = vor.u32 8388608, %v440_v37  ;;  %v784_v47 = vadd.s32 4294967169, %v333_v41 }
 0x10d   :  { %v235_v42 = vadd.s32 1, %v780_v39  ;;  %v1026_v52 = vshll.u32 %v233_v44, 8 }
 0x10e   :  { %v443_v46 = vadd.s32 1, %v788_v40  ;;  %v1028_v53 = vshll.u32 %v441_v45, 8  ;;  %v1030_v54 = vadd.s32 1, %v784_v47 }
 0x10f   :  { %vm236_vm1 = vcmp.gt.s32.totalorder %v235_v42, 0 }
 0x110   :  { %v237_v48 = vsel %vm236_vm1, %v235_v42, 0  ;;  %vm444_vm2 = vcmp.gt.s32.totalorder %v443_v46, 0  ;;  %vm340_vm7 = vcmp.gt.s32.totalorder %v1030_v54, 0 }
 0x111   :  { %v238_v49 = vshrl.u32 %v237_v48, 5  ;;  %v239_v50 = vand.u32 31, %v237_v48  ;;  %v445_v51 = vsel %vm444_vm2, %v443_v46, 0 }
 0x112   :  { %v1037_v59 = vshrl.u32 %v445_v51, 5  ;;  %v447_v60 = vand.u32 31, %v445_v51 }
 0x113   :  { %v240_v56 = vsub.s32 32, %v239_v50  ;;  %v242_v58 = vshll.u32 %v933_v57, %v239_v50  ;;  %v245_v62 = vshll.u32 %v934_v61, %v239_v50  ;;  %v248_v0 = vshll.u32 %v935_v63, %v239_v50 }
 0x114   :  { %v251_v2 = vshll.u32 %v936_v1, %v239_v50  ;;  %v254_v4 = vshll.u32 %v937_v3, %v239_v50  ;;  %vm257_vm3 = vcmp.lt.s32.totalorder %v238_v49, 1  ;;  %vm258_vm4 = vcmp.lt.s32.totalorder %v238_v49, 2 }
 0x115   :  { %v243_v5 = vshrl.u32 %v934_v61, %v240_v56  ;;  %v246_v6 = vshrl.u32 %v935_v63, %v240_v56  ;;  %v249_v7 = vshrl.u32 %v936_v1, %v240_v56  ;;  %v241_v8 = vshrl.u32 %v933_v57, %v240_v56 }
 0x116   :  { %v252_v9 = vshrl.u32 %v937_v3, %v240_v56  ;;  %v255_v11 = vshrl.u32 %v938_v10, %v240_v56  ;;  %v448_v20 = vsub.s32 32, %v447_v60  ;;  %vm259_vm5 = vcmp.lt.s32.totalorder %v238_v49, 3 }
 0x117   :  { %v244_v12 = vor.u32 %v243_v5, %v242_v58  ;;  %v247_v13 = vor.u32 %v246_v6, %v245_v62  ;;  %v250_v17 = vor.u32 %v249_v7, %v248_v0  ;;  %vm260_vm6 = vcmp.lt.s32.totalorder %v238_v49, 4 }
 0x118   :  { %v253_v21 = vor.u32 %v252_v9, %v251_v2  ;;  %v256_v22 = vor.u32 %v255_v11, %v254_v4  ;;  %v450_v36 = vshll.u32 %v933_v57, %v447_v60  ;;  %v451_v39 = vshrl.u32 %v934_v61, %v448_v20 }
 0x119   :  { %v261_v23 = vsel %vm257_vm3, %v241_v8, %v244_v12  ;;  %v262_v25 = vsel %vm260_vm6, %v250_v17, 2102212464  ;;  %v265_v26 = vsel %vm257_vm3, %v244_v12, %v247_v13  ;;  %v269_v31 = vsel %vm257_vm3, %v247_v13, %v250_v17 }
 0x11a   :  { %v263_v33 = vsel %vm259_vm5, %v247_v13, %v262_v25  ;;  %v266_v34 = vsel %vm260_vm6, %v253_v21, 920167782  ;;  %v270_v35 = vsel %vm260_vm6, %v256_v22, 1326507024  ;;  %v453_v40 = vshll.u32 %v934_v61, %v447_v60 }
 0x11b   :  { %v267_v37 = vsel %vm259_vm5, %v250_v17, %v266_v34  ;;  %v271_v38 = vsel %vm259_vm5, %v253_v21, %v270_v35  ;;  %v264_v41 = vsel %vm258_vm4, %v261_v23, %v263_v33  ;;  %v454_v45 = vshrl.u32 %v935_v63, %v448_v20 }
 0x11c   :  { %v268_v42 = vsel %vm258_vm4, %v265_v26, %v267_v37  ;;  %v272_v44 = vsel %vm258_vm4, %v269_v31, %v271_v38  ;;  %v452_v51 = vor.u32 %v451_v39, %v450_v36  ;;  %v456_v58 = vshll.u32 %v935_v63, %v447_v60 }
 0x11d   :  { %v1061_v46 = vmul.u32.u64.low %v1026_v52, %v272_v44  ;;  %v1062_v47 = vmul.u32.u64.high %v1026_v52, %v272_v44, %v1061_v46  ;;  %v1065_v48 = vmul.u32.u64.low %v1026_v52, %v268_v42  ;;  %v1066_v50 = vmul.u32.u64.high %v1026_v52, %v268_v42, %v1065_v48 }
 0x11e   :  { %v455_v56 = vor.u32 %v454_v45, %v453_v40  ;;  %v457_v62 = vshrl.u32 %v936_v1, %v448_v20  ;;  %v449_v49 = vshrl.u32 %v933_v57, %v448_v20  ;;  %v459_v0 = vshll.u32 %v936_v1, %v447_v60 }
 0x11f   :  { %v460_v2 = vshrl.u32 %v937_v3, %v448_v20  ;;  %v463_v4 = vshrl.u32 %v938_v10, %v448_v20  ;;  %v280_v5 = vmul.u32 %v1026_v52, %v264_v41  ;;  %v462_v7 = vshll.u32 %v937_v3, %v447_v60 }
 0x120   :  { %v458_v6 = vor.u32 %v457_v62, %v456_v58  ;;  %vm465_vm8 = vcmp.lt.s32.totalorder %v1037_v59, 1  ;;  %vm282_vm9 = vc.u32 %v1062_v47, %v1065_v48  ;;  %v283_v8 = vadd.s32 1, %v1066_v50 }
 0x121   :  { %v461_v9 = vor.u32 %v460_v2, %v459_v0  ;;  %vm466_vm10 = vcmp.lt.s32.totalorder %v1037_v59, 2  ;;  %v464_v11 = vor.u32 %v463_v4, %v462_v7  ;;  %vm467_vm11 = vcmp.lt.s32.totalorder %v1037_v59, 3 }
 0x122   :  { %vm468_vm12 = vcmp.lt.s32.totalorder %v1037_v59, 4  ;;  %v473_v12 = vsel %vm465_vm8, %v452_v51, %v455_v56  ;;  %v284_v52 = vsel %vm282_vm9, %v283_v8, %v1066_v50  ;;  %v477_v17 = vsel %vm465_vm8, %v455_v56, %v458_v6 }
 0x123   :  { %v470_v13 = vsel %vm468_vm12, %v458_v6, 2102212464  ;;  %v474_v60 = vsel %vm468_vm12, %v461_v9, 920167782  ;;  %v285_v20 = vadd.s32 %v284_v52, %v280_v5  ;;  %v469_v21 = vsel %vm465_vm8, %v449_v49, %v452_v51 }
 0x124   :  { %v475_v22 = vsel %vm467_vm11, %v458_v6, %v474_v60  ;;  %v478_v23 = vsel %vm468_vm12, %v464_v11, 1326507024  ;;  %v471_v25 = vsel %vm467_vm11, %v455_v56, %v470_v13  ;;  %v341_v33 = vsel %vm340_vm7, %v1030_v54, 0 }
 0x125   :  { %v476_v26 = vsel %vm466_vm10, %v473_v12, %v475_v22  ;;  %v479_v31 = vsel %vm467_vm11, %v461_v9, %v478_v23  ;;  %v286_v34 = vadd.s32 536870912, %v285_v20  ;;  %v472_v41 = vsel %vm466_vm10, %v469_v21, %v471_v25 }
 0x126   :  { %v480_v35 = vsel %vm466_vm10, %v477_v17, %v479_v31  ;;  %v1093_v36 = vmul.u32.u64.low %v1028_v53, %v476_v26  ;;  %v1094_v37 = vmul.u32.u64.high %v1028_v53, %v476_v26, %v1093_v36  ;;  %v343_v42 = vand.u32 31, %v341_v33 }
 0x127   :  { %v1098_v38 = vmul.u32.u64.low %v1028_v53, %v480_v35  ;;  %v1099_v39 = vmul.u32.u64.high %v1028_v53, %v480_v35, %v1098_v38  ;;  %v1101_v40 = vshrl.u32 %v286_v34, 30  ;;  %v1109_v46 = vadd.f32 %v1014_v29, %v1034_v55 }
 0x128   :  { %v491_v44 = vadd.s32 1, %v1094_v37  ;;  %v344_v45 = vsub.s32 32, %v343_v42  ;;  %v488_v50 = vmul.u32 %v1028_v53, %v472_v41  ;;  %v329_v58 = vand.u32 2147483647, %v1012_v28 }
 0x129   :  { %v288_v54 = vshll.u32 %v1101_v40, 30  ;;  %vm490_vm13 = vc.u32 %v1099_v39, %v1093_v36  ;;  %v540_v49 = vand.u32 2139095040, %v1109_v46  ;;  %v342_v2 = vshrl.u32 %v341_v33, 5 }
 0x12a   :  { %v492_v59 = vsel %vm490_vm13, %v491_v44, %v1094_v37  ;;  %v347_v62 = vshrl.u32 %v934_v61, %v344_v45  ;;  %v350_v55 = vshrl.u32 %v935_v63, %v344_v45  ;;  %v353_v53 = vshrl.u32 %v936_v1, %v344_v45 }
 0x12b   :  { %v1114_v51 = vsub.s32 %v285_v20, %v288_v54  ;;  %v493_v56 = vadd.s32 %v492_v59, %v488_v50  ;;  %v346_v4 = vshll.u32 %v933_v57, %v343_v42  ;;  %v349_v5 = vshll.u32 %v934_v61, %v343_v42 }
 0x12c   :  { %v356_v6 = vshrl.u32 %v937_v3, %v344_v45  ;;  %v352_v8 = vshll.u32 %v935_v63, %v343_v42  ;;  %v355_v9 = vshll.u32 %v936_v1, %v343_v42  ;;  %v359_v11 = vshrl.u32 %v938_v10, %v344_v45 }
 0x12d   :  { %v291_v0 = vsub.s32 0, %v1114_v51  ;;  %v494_v29 = vadd.s32 536870912, %v493_v56  ;;  %v336_v12 = vand.u32 8388607, %v329_v58  ;;  %v348_v52 = vor.u32 %v347_v62, %v346_v4 }
 0x12e   :  { %v358_v13 = vshll.u32 %v937_v3, %v343_v42  ;;  %v351_v17 = vor.u32 %v350_v55, %v349_v5  ;;  %v354_v20 = vor.u32 %v353_v53, %v352_v8  ;;  %v357_v21 = vor.u32 %v356_v6, %v355_v9 }
 0x12f   :  { %v1126_v7 = vshrl.u32 %v494_v29, 30  ;;  %v781_v60 = vmin.u32 %v291_v0, %v1114_v51  ;;  %vm364_vm14 = vcmp.lt.s32.totalorder %v342_v2, 4  ;;  %v541_v25 = vshrl.u32 %v540_v49, 23 }
 0x130   :  { %v360_v23 = vor.u32 %v359_v11, %v358_v13  ;;  %v370_v26 = vsel %vm364_vm14, %v357_v21, 920167782  ;;  %v337_v31 = vor.u32 8388608, %v336_v12  ;;  %vm361_vm15 = vcmp.lt.s32.totalorder %v342_v2, 1 }
 0x131   :  { %v496_v22 = vshll.u32 %v1126_v7, 30  ;;  %vm363_vm0 = vcmp.lt.s32.totalorder %v342_v2, 3  ;;  %v293_v33 = vclz %v781_v60  ;;  %v369_v34 = vsel %vm361_vm15, %v348_v52, %v351_v17 }
 0x132   :  { %v371_v35 = vsel %vm363_vm0, %v354_v20, %v370_v26  ;;  %v373_v37 = vsel %vm361_vm15, %v351_v17, %v354_v20  ;;  %v374_v41 = vsel %vm364_vm14, %v360_v23, 1326507024  ;;  %v792_v42 = vadd.s32 4294967169, %v541_v25 }
 0x133   :  { %v1139_v38 = vsub.s32 %v493_v56, %v496_v22  ;;  %v345_v54 = vshrl.u32 %v933_v57, %v344_v45  ;;  %vm362_vm1 = vcmp.lt.s32.totalorder %v342_v2, 2  ;;  %v366_v44 = vsel %vm364_vm14, %v354_v20, 2102212464 }
 0x134   :  { %v375_v50 = vsel %vm363_vm0, %v357_v21, %v374_v41  ;;  %v372_v59 = vsel %vm362_vm1, %v369_v34, %v371_v35  ;;  %v377_v49 = vshll.u32 %v337_v31, 8  ;;  %v782_v0 = vadd.s32 4294967294, %v293_v33 }
 0x135   :  { %v376_v62 = vsel %vm362_vm1, %v373_v37, %v375_v50  ;;  %v365_v29 = vsel %vm361_vm15, %v345_v54, %v348_v52  ;;  %v499_v55 = vsub.s32 0, %v1139_v38  ;;  %v367_v53 = vsel %vm363_vm0, %v351_v17, %v366_v44 }
 0x136   :  { %v1146_v56 = vmul.u32.u64.low %v377_v49, %v376_v62  ;;  %v1147_v4 = vmul.u32.u64.high %v377_v49, %v376_v62, %v1146_v56  ;;  %v1149_v5 = vmul.u32.u64.low %v377_v49, %v372_v59  ;;  %v1150_v6 = vmul.u32.u64.high %v377_v49, %v372_v59, %v1149_v5 }
 0x137   :  { %v547_v45 = vadd.s32 1, %v792_v42  ;;  %v368_v8 = vsel %vm362_vm1, %v365_v29, %v367_v53  ;;  %vm783_vm3 = vcmp.lt.s32.totalorder %v782_v0, 0  ;;  %v789_v9 = vmin.u32 %v499_v55, %v1139_v38 }
 0x138   :  { %vm386_vm4 = vc.u32 %v1147_v4, %v1149_v5  ;;  %v387_v11 = vadd.s32 1, %v1150_v6  ;;  %v384_v2 = vmul.u32 %v377_v49, %v368_v8  ;;  %v537_v12 = vand.u32 2147483647, %v1109_v46 }
 0x139   :  { %vm548_vm2 = vcmp.gt.s32.totalorder %v547_v45, 0  ;;  %v1158_v13 = vsel %vm783_vm3, 0, %v782_v0  ;;  %v501_v17 = vclz %v789_v9  ;;  %vm227_vm12 = vcmp.lt.s32.totalorder %v1008_v24, 0 }
 0x13a   :  { %v549_v52 = vsel %vm548_vm2, %v547_v45, 0  ;;  %v388_v60 = vsel %vm386_vm4, %v387_v11, %v1150_v6  ;;  %v301_v22 = vsub.s32 4294967266, %v1158_v13  ;;  %v544_v25 = vand.u32 8388607, %v537_v12 }
 0x13b   :  { %v389_v20 = vadd.s32 %v388_v60, %v384_v2  ;;  %v551_v21 = vand.u32 31, %v549_v52  ;;  %v790_v31 = vadd.s32 4294967294, %v501_v17  ;;  %v550_v0 = vshrl.u32 %v549_v52, 5 }
 0x13c   :  { %v302_v37 = vadd.s32 127, %v301_v22  ;;  %v545_v42 = vor.u32 8388608, %v544_v25  ;;  %v297_v9 = vsub.s32 32, %v1158_v13  ;;  %vm331_vm13 = vcmp.lt.s32.totalorder %v1012_v28, 0 }
 0x13d   :  { %v390_v23 = vadd.s32 536870912, %v389_v20  ;;  %v552_v26 = vsub.s32 32, %v551_v21  ;;  %v554_v44 = vshll.u32 %v933_v57, %v551_v21  ;;  %v557_v50 = vshll.u32 %v934_v61, %v551_v21 }
 0x13e   :  { %v563_v59 = vshll.u32 %v936_v1, %v551_v21  ;;  %vm791_vm5 = vcmp.lt.s32.totalorder %v790_v31, 0  ;;  %v560_v29 = vshll.u32 %v935_v63, %v551_v21  ;;  %vm569_vm6 = vcmp.lt.s32.totalorder %v550_v0, 1 }
 0x13f   :  { %v1164_v33 = vshrl.u32 %v390_v23, 30  ;;  %v555_v34 = vshrl.u32 %v934_v61, %v552_v26  ;;  %v558_v35 = vshrl.u32 %v935_v63, %v552_v26  ;;  %v561_v54 = vshrl.u32 %v936_v1, %v552_v26 }
 0x140   :  { %v564_v62 = vshrl.u32 %v937_v3, %v552_v26  ;;  %v567_v6 = vshrl.u32 %v938_v10, %v552_v26  ;;  %v566_v61 = vshll.u32 %v937_v3, %v551_v21  ;;  %v281_v1 = vadd.s32 %v1065_v48, %v1062_v47 }
 0x141   :  { %v392_v41 = vshll.u32 %v1164_v33, 30  ;;  %v556_v55 = vor.u32 %v555_v34, %v554_v44  ;;  %v559_v53 = vor.u32 %v558_v35, %v557_v50  ;;  %v562_v8 = vor.u32 %v561_v54, %v560_v29 }
 0x142   :  { %v565_v56 = vor.u32 %v564_v62, %v563_v59  ;;  %v504_v11 = vsel %vm791_vm5, 0, %v790_v31  ;;  %v568_v52 = vor.u32 %v567_v6, %v566_v61  ;;  %vm572_vm7 = vcmp.lt.s32.totalorder %v550_v0, 4 }
 0x143   :  { %v1174_v49 = vsub.s32 %v389_v20, %v392_v41  ;;  %v303_v63 = vshll.u32 %v302_v37, 23  ;;  %v577_v60 = vsel %vm569_vm6, %v556_v55, %v559_v53  ;;  %v585_v17 = vshll.u32 %v545_v42, 8 }
 0x144   :  { %v578_v10 = vsel %vm572_vm7, %v565_v56, 920167782  ;;  %v553_v22 = vshrl.u32 %v933_v57, %v552_v26  ;;  %vm571_vm8 = vcmp.lt.s32.totalorder %v550_v0, 3  ;;  %v574_v3 = vsel %vm572_vm7, %v562_v8, 2102212464 }
 0x145   :  { %v395_v45 = vsub.s32 0, %v1174_v49  ;;  %v509_v47 = vsub.s32 4294967266, %v504_v11  ;;  %vm570_vm9 = vcmp.lt.s32.totalorder %v550_v0, 2  ;;  %v579_v48 = vsel %vm571_vm8, %v562_v8, %v578_v10 }
 0x146   :  { %v581_v21 = vsel %vm569_vm6, %v559_v53, %v562_v8  ;;  %v573_v25 = vsel %vm569_vm6, %v553_v22, %v556_v55  ;;  %v580_v31 = vsel %vm570_vm9, %v577_v60, %v579_v48  ;;  %v582_v34 = vsel %vm572_vm7, %v568_v52, 1326507024 }
 0x147   :  { %v785_v2 = vmin.u32 %v395_v45, %v1174_v49  ;;  %v575_v35 = vsel %vm571_vm8, %v559_v53, %v574_v3  ;;  %v583_v37 = vsel %vm571_vm8, %v565_v56, %v582_v34  ;;  %v298_v57 = vshll.u32 %v1114_v51, %v1158_v13 }
 0x148   :  { %v1189_v41 = vmul.u32.u64.low %v585_v17, %v580_v31  ;;  %v1190_v42 = vmul.u32.u64.high %v585_v17, %v580_v31, %v1189_v41  ;;  %v299_v26 = vshrl.u32 %v281_v1, %v297_v9  ;;  %v584_v54 = vsel %vm570_vm9, %v581_v21, %v583_v37 }
 0x149   :  { %v397_v20 = vclz %v785_v2  ;;  %v510_v44 = vadd.s32 127, %v509_v47  ;;  %v1196_v59 = vmul.u32.u64.low %v585_v17, %v584_v54  ;;  %v1197_v62 = vmul.u32.u64.high %v585_v17, %v584_v54, %v1196_v59 }
 0x14a   :  { %v385_v29 = vadd.s32 %v1149_v5, %v1147_v4  ;;  %v576_v56 = vsel %vm570_vm9, %v573_v25, %v575_v35  ;;  %v304_v6 = vor.u32 4788187, %v303_v63  ;;  %v505_v45 = vsub.s32 32, %v504_v11 }
 0x14b   :  { %v786_v23 = vadd.s32 4294967294, %v397_v20  ;;  %v595_v51 = vadd.s32 1, %v1190_v42  ;;  %v300_v13 = vor.u32 %v299_v26, %v298_v57  ;;  %v489_v8 = vadd.s32 %v1093_v36, %v1099_v39 }
 0x14c   :  { %v511_v9 = vshll.u32 %v510_v44, 23  ;;  %v592_v52 = vmul.u32 %v585_v17, %v576_v56  ;;  %vm594_vm11 = vc.u32 %v1197_v62, %v1189_v41  ;;  %v305_v0 = vand.u32 2147483647, %v304_v6 }
 0x14d   :  { %vm787_vm10 = vcmp.lt.s32.totalorder %v786_v23, 0  ;;  %v596_v5 = vsel %vm594_vm11, %v595_v51, %v1190_v42  ;;  %v507_v63 = vshrl.u32 %v489_v8, %v505_v45  ;;  %v307_v22 = vcvt.s32.f32 %v300_v13 }
 0x14e   :  { %v400_v50 = vsel %vm787_vm10, 0, %v786_v23  ;;  %v597_v10 = vadd.s32 %v596_v5, %v592_v52  ;;  %v506_v36 = vshll.u32 %v1139_v38, %v504_v11  ;;  %v512_v39 = vor.u32 4788187, %v511_v9 }
 0x14f   :  { %v401_v55 = vsub.s32 32, %v400_v50  ;;  %v405_v53 = vsub.s32 4294967266, %v400_v50  ;;  %v402_v2 = vshll.u32 %v1174_v49, %v400_v50  ;;  %v308_v48 = vmul.f32 %v307_v22, %v305_v0 }
 0x150   :  { %v598_v3 = vadd.s32 536870912, %v597_v10  ;;  %v508_v49 = vor.u32 %v507_v63, %v506_v36  ;;  %v513_v23 = vand.u32 2147483647, %v512_v39  ;;  %vm1219_vm14 = vcmp.le.f32.partialorder %v225_v30, 0.7853982 }
 0x151   :  { %v403_v61 = vshrl.u32 %v385_v29, %v401_v55  ;;  %v406_v1 = vadd.s32 127, %v405_v53  ;;  %v309_v34 = vxor.u32 2147483648, %v308_v48  ;;  %vm1230_vm15 = vcmp.le.f32.partialorder %v329_v58, 0.7853982 }
 0x152   :  { %v1210_v21 = vshrl.u32 %v598_v3, 30  ;;  %v515_v35 = vcvt.s32.f32 %v508_v49  ;;  %v311_v30 = vsub.s32 4, %v1101_v40  ;;  %vm435_vm0 = vcmp.lt.s32.totalorder %v1010_v27, 0 }
 0x153   :  { %v407_v4 = vshll.u32 %v406_v1, 23  ;;  %v404_v60 = vor.u32 %v403_v61, %v402_v2  ;;  %v310_v38 = vsel %vm227_vm12, %v309_v34, %v308_v48  ;;  %v415_v45 = vsub.s32 4, %v1164_v33 }
 0x154   :  { %v600_v31 = vshll.u32 %v1210_v21, 30  ;;  %v516_v42 = vmul.f32 %v515_v35, %v513_v23  ;;  %v313_v29 = vsel %vm1219_vm14, %v1008_v24, %v310_v38  ;;  %vm1244_vm2 = vcmp.le.f32.partialorder %v433_v32, 0.7853982 }
 0x155   :  { %v408_v20 = vor.u32 4788187, %v407_v4  ;;  %v411_v17 = vcvt.s32.f32 %v404_v60  ;;  %838 = vcosq.f32 %v313_v29  ;;  %v593_v13 = vadd.s32 %v1189_v41, %v1197_v62  ;;  %v55_v62 = vld [vmem:[%s1340_s3] sm:$0xf] }
 0x156   :  { %v601_v37 = vsub.s32 %v597_v10, %v600_v31  ;;  %v517_v44 = vxor.u32 2147483648, %v516_v42  ;;  %840 = vsinq.f32 %v313_v29  ;;  %v312_v1 = vsel %vm227_vm12, %v311_v30, %v1101_v40 }
 0x157   :  { %v409_v47 = vand.u32 2147483647, %v408_v20  ;;  %v519_v9 = vsub.s32 4, %v1126_v7  ;;  %v416_v2 = vsel %vm331_vm13, %v415_v45, %v1164_v33  ;;  %v314_v40 = vsel %vm1219_vm14, 0, %v312_v1 }
 0x158   :  { %v603_v26 = vsub.s32 0, %v601_v37  ;;  %v518_v6 = vsel %vm435_vm0, %v517_v44, %v516_v42  ;;  %v418_v63 = vsel %vm1230_vm15, 0, %v416_v2  ;;  %vm56_vm3 = vcmp.ne.f32.partialorder %v55_v62, 0.0 }
 0x159   :  { %v412_v25 = vmul.f32 %v411_v17, %v409_v47  ;;  %v521_v32 = vsel %vm1244_vm2, %v1010_v27, %v518_v6  ;;  %v520_v33 = vsel %vm435_vm0, %v519_v9, %v1126_v7  ;;  %v318_v10 = vadd.s32 3, %v314_v40 }
 0x15a   :  { %v793_v11 = vmin.u32 %v603_v26, %v601_v37  ;;  %v422_v22 = vadd.s32 3, %v418_v63  ;;  %v939_v47 = vmov 0   ;;  %v522_v49 = vsel %vm1244_vm2, 0, %v520_v33 }
 0x15b   :  { %v413_v57 = vxor.u32 2147483648, %v412_v25  ;;  %v641_v48 = vsel %vm56_vm3, 1, %v939_v47  ;;  %v319_v34 = vand.u32 3, %v318_v10  ;;  %v526_v35 = vadd.s32 3, %v522_v49 }
 0x15c   :  { %v605_v59 = vclz %v793_v11  ;;  %v645_v7 = vrot.slane %v641_v48, %v61_v16  ;;  %vm1277_vm4 = vcmp.le.f32.partialorder %v537_v12, 0.7853982  ;;  %vm539_vm5 = vcmp.lt.s32.totalorder %v1109_v46, 0 }
 0x15d   :  { %v414_v50 = vsel %vm331_vm13, %v413_v57, %v412_v25  ;;  %v623_v25 = vsub.s32 4, %v1210_v21  ;;  %vm321_vm6 = vcmp.eq.s32.totalorder %v319_v34, 0  ;;  %vm324_vm7 = vcmp.eq.s32.totalorder %v319_v34, 2 }
 0x15e   :  { %v794_v53 = vadd.s32 4294967294, %v605_v59  ;;  %v417_v56 = vsel %vm1230_vm15, %v1012_v28, %v414_v50  ;;  %v527_v55 = vand.u32 3, %v526_v35  ;;  %v649_v58 = vrot.slane %v641_v48, %v65_v19 }
 0x15f   :  { %842 = vcosq.f32 %v417_v56  ;;  %v839_v20 = vpop.eup %838  ;;  %v624_v59 = vsel %vm539_vm5, %v623_v25, %v1210_v21  ;;  %vm320_vm10 = vcmp.lt.s32.totalorder %v319_v34, 2  ;;  %vm658_vm14 = vcmp.eq.s32.totalorder %v645_v7, 1 }
 0x160   :  { %vm795_vm1 = vcmp.lt.s32.totalorder %v794_v53, 0  ;;  %844 = vsinq.f32 %v417_v56  ;;  %v841_v3 = vpop.eup %840  ;;  %v325_v26 = vxor.u32 2147483648, %v839_v20  ;;  %v626_v30 = vsel %vm1277_vm4, 0, %v624_v59 }
 0x161   :  { %v608_v51 = vsel %vm795_vm1, 0, %v794_v53  ;;  %846 = vcosq.f32 %v521_v32  ;;  %v322_v57 = vxor.u32 2147483648, %v841_v3  ;;  %vm529_vm12 = vcmp.eq.s32.totalorder %v527_v55, 0 }
 0x162   :  { %v609_v8 = vsub.s32 32, %v608_v51  ;;  %v613_v61 = vsub.s32 4294967266, %v608_v51  ;;  %v610_v52 = vshll.u32 %v601_v37, %v608_v51  ;;  %848 = vsinq.f32 %v521_v32 }
 0x163   :  { %v423_v37 = vand.u32 3, %v422_v22  ;;  %v323_v12 = vsel %vm321_vm6, %v839_v20, %v322_v57  ;;  %v326_v53 = vsel %vm324_vm7, %v325_v26, %v841_v3  ;;  %v940_v51 = vmov 1966171168  }
 0x164   :  { %v611_v4 = vshrl.u32 %v593_v13, %v609_v8  ;;  %v614_v41 = vadd.s32 127, %v613_v61  ;;  %v675_v13 = vunpack.c.l.s4 %v940_v51  ;;  %v630_v8 = vadd.s32 3, %v626_v30 }
 0x165   :  { %vm425_vm8 = vcmp.eq.s32.totalorder %v423_v37, 0  ;;  %vm428_vm9 = vcmp.eq.s32.totalorder %v423_v37, 2  ;;  %vm424_vm11 = vcmp.lt.s32.totalorder %v423_v37, 2  ;;  %v327_v61 = vsel %vm320_vm10, %v323_v12, %v326_v53 }
 0x166   :  { %v612_v5 = vor.u32 %v611_v4, %v610_v52  ;;  %v615_v0 = vshll.u32 %v614_v41, 23  ;;  %vm532_vm13 = vcmp.eq.s32.totalorder %v527_v55, 2  ;;  %vm317_vm15 = vweird.f32 %v1008_v24 }
 0x167   :  { %v653_v2 = vrot.slane %v641_v48, %v69_v18  ;;  %vm421_vm0 = vweird.f32 %v1012_v28  ;;  %vm659_vm1 = vcmp.eq.s32.totalorder %v649_v58, 1  ;;  %v328_v19 = vsel %vm317_vm15, nan, %v327_v61 }
 0x168   :  { %v616_v60 = vor.u32 4788187, %v615_v0  ;;  %v619_v39 = vcvt.s32.f32 %v612_v5  ;;  %vm528_vm2 = vcmp.lt.s32.totalorder %v527_v55, 2  ;;  %v631_v4 = vand.u32 3, %v630_v8 }
 0x169   :  { %v843_v17 = vpop.eup %842  ;;  %v676_v41 = vunpack.c.0.s8 %v675_v13  ;;  %v657_v40 = vrot.slane %v641_v48, %v73_v43  ;;  %v662_v63 = vsel %vm658_vm14, %v1008_v24, %v328_v19  ;;  %vm525_vm3 = vweird.f32 %v1010_v27 }
 0x16a   :  { %v617_v36 = vand.u32 2147483647, %v616_v60  ;;  %v845_v31 = vpop.eup %844  ;;  %v429_v44 = vxor.u32 2147483648, %v843_v17  ;;  %vm633_vm6 = vcmp.eq.s32.totalorder %v631_v4, 0  ;;  %vm1305_vm10 = vcmp.lt.s32.totalorder %v59_v14, 512 }
 0x16b   :  { %v847_v11 = vpop.eup %846  ;;  %v426_v54 = vxor.u32 2147483648, %v845_v31  ;;  %v679_v20 = vsub.s32 %v676_v41, %v994_v15  ;;  %vm661_vm7 = vcmp.eq.s32.totalorder %v657_v40, 1 }
 0x16c   :  { %v620_v23 = vmul.f32 %v619_v39, %v617_v36  ;;  %v849_v16 = vpop.eup %848  ;;  %v533_v6 = vxor.u32 2147483648, %v847_v11  ;;  %v430_v45 = vsel %vm428_vm9, %v429_v44, %v845_v31  ;;  %vm629_vm9 = vweird.f32 %v1109_v46 }
 0x16d   :  { %v530_v56 = vxor.u32 2147483648, %v849_v16  ;;  %v427_v21 = vsel %vm425_vm8, %v843_v17, %v426_v54  ;;  %vm632_vm8 = vcmp.lt.s32.totalorder %v631_v4, 2 }
 0x16e   :  { %v621_v42 = vxor.u32 2147483648, %v620_v23  ;;  %v431_v1 = vsel %vm424_vm11, %v427_v21, %v430_v45  ;;  %v534_v32 = vsel %vm532_vm13, %v533_v6, %v849_v16 }
 0x16f   :  { %v531_v9 = vsel %vm529_vm12, %v847_v11, %v530_v56  ;;  %v432_v52 = vsel %vm421_vm0, nan, %v431_v1 }
 0x170   :  { %v622_v50 = vsel %vm539_vm5, %v621_v42, %v620_v23  ;;  %v535_v62 = vsel %vm528_vm2, %v531_v9, %v534_v32  ;;  %v663_v18 = vsel %vm659_vm1, %v1012_v28, %v432_v52  ;;  %vm636_vm5 = vcmp.eq.s32.totalorder %v631_v4, 2 }
 0x171   :  { %v625_v29 = vsel %vm1277_vm4, %v1109_v46, %v622_v50  ;;  %v536_v60 = vsel %vm525_vm3, nan, %v535_v62  ;;  %vm660_vm4 = vcmp.eq.s32.totalorder %v653_v2, 1  ;;  %v670_v43 = vcombine.low %v662_v63, %v663_v18 }
 0x172   :  { %850 = vcosq.f32 %v625_v29  ;;  %v671_v36 = vcombine.high %v662_v63, %v663_v18  ;;  %v664_v24 = vsel %vm660_vm4, %v1010_v27, %v536_v60 }
 0x173   :  { %852 = vsinq.f32 %v625_v29  ;;  %v680_v48 = vrot.slane %v670_v43, %v679_v20 }
 0x174   :  { %v687_v49 = vrot.slane %v671_v36, %v679_v20 }
 0x17c   :  { %v851_v5 = vpop.eup %850 }
 0x17d   :  { %v853_v0 = vpop.eup %852  ;;  %v637_v33 = vxor.u32 2147483648, %v851_v5 }
 0x17e   :  { %v634_v10 = vxor.u32 2147483648, %v853_v0 }
 0x17f   :  { %v638_v22 = vsel %vm636_vm5, %v637_v33, %v853_v0 }
 0x180   :  { %v635_v39 = vsel %vm633_vm6, %v851_v5, %v634_v10 }
 0x181   :  { %v639_v3 = vsel %vm632_vm8, %v635_v39, %v638_v22 }
 0x182   :  { %v640_v28 = vsel %vm629_vm9, nan, %v639_v3 }
 0x183   :  { %v665_v47 = vsel %vm661_vm7, %v1109_v46, %v640_v28 }
 0x184   :  { %v672_v17 = vcombine.low %v664_v24, %v665_v47  ;;  %v673_v23 = vcombine.high %v664_v24, %v665_v47 }
 0x186   :  { %v694_v15 = vrot.slane %v672_v17, %v679_v20  ;;  %v701_v25 = vrot.slane %v673_v23, %v679_v20 }
 0x188   :  { %v702_v31 = vcombine.low %v680_v48, %v694_v15  ;;  %v703_v34 = vcombine.high %v680_v48, %v694_v15  ;;  %v704_v7 = vcombine.low %v687_v49, %v701_v25  ;;  %v705_v35 = vcombine.high %v687_v49, %v701_v25 }
 0x18a   :  { %v712_v27 = vrot.slane %v702_v31, %v679_v20  ;;  %v719_v42 = vrot.slane %v704_v7, %v679_v20  ;;  %v726_v57 = vrot.slane %v703_v34, %v679_v20  ;;  %v733_v26 = vrot.slane %v705_v35, %v679_v20 }
 0x18c   :  { %v734_v46 = vcombine.high %v712_v27, %v712_v27  ;;  %v735_v38 = vcombine.high %v719_v42, %v719_v42  ;;  %v736_v11 = vcombine.high %v726_v57, %v726_v57  ;;  %v737_v54 = vcombine.high %v733_v26, %v733_v26  ;;  %752 = vst.msk [vmem:[#allocation7] sm:$0xf] %vm1305_vm10, %v712_v27 }
 0x18d   :  { %753 = vst.msk [vmem:[#allocation7 + $0x4] sm:$0xf] %vm1305_vm10, %v726_v57  ;;  %756 = vst.msk [vmem:[#allocation7 + $0x10] sm:$0xf] %vm1305_vm10, %v719_v42 }
 0x18e   :  { %757 = vst.msk [vmem:[#allocation7 + $0x14] sm:$0xf] %vm1305_vm10, %v733_v26  ;;  %754 = vst.msk [vmem:[#allocation7 + $0x8] sm:$0xf] %vm1305_vm10, %v734_v46 }
 0x18f   :  { %755 = vst.msk [vmem:[#allocation7 + $0xc] sm:$0xf] %vm1305_vm10, %v736_v11  ;;  %758 = vst.msk [vmem:[#allocation7 + $0x18] sm:$0xf] %vm1305_vm10, %v735_v38 }
 0x190   :  { %759 = vst.msk [vmem:[#allocation7 + $0x1c] sm:$0xf] %vm1305_vm10, %v737_v54 }
 0x191   :  { %764 = vsyncadd [#allocation4], 448  ;;  %s941_s3 = smov [#allocation7]  }
 0x192   :  { %s765_s19 = sshll.u32 %s941_s3, 4  ;;  %s766_s19 = int_to_ptr.vmem [resolvable:$true] %s765_s19 }
 0x193   :  { %s898_s20 = scalar_lea.vmem %s766_s19, 64  ;;  %s902_s21 = scalar_lea.vmem %s766_s19, 512 }
 0x194   :  { %p899_p2 = scmp.ne.s32.totalorder %s766_s19, %s898_s20  ;;  %p903_p3 = scmp.lt.s32.totalorder %s766_s19, %s766_s19 }
 0x195   :  { %p904_p4 = scmp.lt.s32.totalorder %s902_s21, %s898_s20 }
 0x197   :  { %p905_p5 = por %p904_p4, %p903_p3 }
 0x199   :  { %p906_p6 = pnand %p905_p5, %p899_p2 }
 0x19b   :  { %909 = shalt.err (!%p906_p6)
}
 0x19c   :  { %s910_s24 = scalar_lea.hbm %s1341_s4, 64 }
 0x19d   :  { %p911_p7 = scmp.ne.s32.totalorder %s1341_s4, %s910_s24  ;;  %p914_p8 = scmp.lt.u32.totalorder %s910_s24, %s1341_s4 }
 0x19f   :  { %p916_p9 = pnand %p914_p8, %p911_p7 }
 0x1a1   :  { %919 = shalt.err (!%p916_p9)
}
 0x1a2   :  { %s942_s29 = smov 64   ;;  %s943_s30 = smov 4  }
 0x1a3   :  { %771 = dma.vmem_to_hbm [thread:$0]  %s766_s19, 64, %s1341_s4, [#allocation4], %s942_s29, %s942_s29, %s943_s30  }
 0x1a4   :  { %924 = dma.done.wait [#allocation4], 512  }
 0x1a5   :  { %925 = vsyncadd [#allocation4], 4294966784 }
 0x1a6   :  { %775 = vsyncpa [#allocation3], 1 }
 0x1a7   :  { %776 = vsyncpa [#allocation6], 1 }
 0x1a8   :  { %777 = vsyncpa [#allocation4], 1 }

</bundles_post_ra>
